<compile_context>
chip_gen: v7x
topology: tpu7x:2x2x1
jax: 0.10.0
libtpu: 0.0.40
codegen_flags: <defaults>
</compile_context>

<pallas_src>
import math

import jax
import jax.numpy as jnp
from jax import lax
from jax.experimental import pallas as pl
from jax.experimental.pallas import tpu as pltpu


def _round_up(x, m):
    return ((x + m - 1) // m) * m


def _make_kernel(alpha, mrg, b_actual, tile_b, tile_c, apply_b_mask):
    alpha = float(alpha)
    mrg = float(mrg)

    def kernel(x_ref, p_ref, t_ref, pos_ref, neg_ref, cnt_ref, pn_ref):
        pid_c = pl.program_id(0)
        pid_b = pl.program_id(1)

        # ---- per-C-tile setup (runs once per C tile, at the first B step) ----
        @pl.when(pid_b == 0)
        def _init():
            pos_ref[...] = jnp.zeros_like(pos_ref)
            neg_ref[...] = jnp.zeros_like(neg_ref)
            cnt_ref[...] = jnp.zeros_like(cnt_ref)
            # l2_norm of the proxy tile: x * rsqrt(sum(x^2) + 1e-12)
            P = p_ref[...].astype(jnp.float32)                       # (TILE_C, D)
            p_inv = lax.rsqrt(jnp.sum(P * P, axis=1, keepdims=True) + 1e-12)
            pn_ref[...] = (P * p_inv).astype(jnp.bfloat16)           # cached bf16

        X = x_ref[...].astype(jnp.float32)                           # (TILE_B, D)
        labels = t_ref[...]                                          # (TILE_B, 1) int32

        # ---- l2_norm of the X tile (matches torch l2_norm) ----
        x_inv = lax.rsqrt(jnp.sum(X * X, axis=1, keepdims=True) + 1e-12)
        Xn = (X * x_inv).astype(jnp.bfloat16)

        # ---- cosine similarity tile: Xn @ Pn.T on the MXU, f32 accumulate ----
        cos = lax.dot_general(Xn, pn_ref[...], (((1,), (1,)), ((), ())),
                              preferred_element_type=jnp.float32)    # (TILE_B, TILE_C)

        # ---- one-hot mask against the global class ids of this C tile ----
        class_ids = pid_c * tile_c + lax.broadcasted_iota(
            jnp.int32, (1, tile_c), 1)                               # (1, TILE_C)
        pos_mask = class_ids == labels                               # (TILE_B, TILE_C)

        if apply_b_mask:  # compile-time flag: only when B was padded
            row_ids = pid_b * tile_b + lax.broadcasted_iota(
                jnp.int32, (tile_b, 1), 0)                           # (TILE_B, 1)
            valid = row_ids < b_actual
            pos_sel = jnp.logical_and(pos_mask, valid)
            neg_sel = jnp.logical_and(jnp.logical_not(pos_mask), valid)
        else:
            pos_sel = pos_mask
            neg_sel = jnp.logical_not(pos_mask)

        # ---- single exp per element; the mask picks the exponent ----
        arg = jnp.where(pos_mask, (-alpha) * (cos - mrg), alpha * (cos + mrg))
        e = jnp.exp(arg)

        p_part = jnp.sum(jnp.where(pos_sel, e, 0.0), axis=0, keepdims=True)
        n_part = jnp.sum(jnp.where(neg_sel, e, 0.0), axis=0, keepdims=True)
        c_part = jnp.sum(pos_sel.astype(jnp.float32), axis=0, keepdims=True)

        pos_ref[...] += p_part.reshape(1, 1, tile_c)
        neg_ref[...] += n_part.reshape(1, 1, tile_c)
        cnt_ref[...] += c_part.reshape(1, 1, tile_c)

        # ---- finalize: log(1 + sum) per class.  Divisions by num_valid /
        #      nb_classes happen exactly once, in the wrapper. ----
        @pl.when(pid_b == pl.num_programs(1) - 1)
        def _finalize():
            pos_ref[...] = jnp.log(1.0 + pos_ref[...])
            neg_ref[...] = jnp.log(1.0 + neg_ref[...])

    return kernel


def proxy_anchor_loss(X, T, proxies, *, mrg=0.1, alpha=32,
                      tile_b=512, tile_c=1024):
    """Proxy-Anchor loss.  X: (B, D) embeddings, T: (B,) int labels, proxies: (C, D)."""
    B, D = X.shape
    C, Dp = proxies.shape
    assert D == Dp

    tb = min(int(tile_b), _round_up(B, 8))
    tc = min(int(tile_c), _round_up(C, 128))
    b_pad = _round_up(B, tb)
    c_pad = _round_up(C, tc)
    n_bt = b_pad // tb
    n_ct = c_pad // tc

    Xp = X.astype(jnp.float32)
    Pp = proxies.astype(jnp.float32)
    T2d = T.astype(jnp.int32).reshape(B, 1)
    if b_pad != B:
        Xp = jnp.pad(Xp, ((0, b_pad - B), (0, 0)))
        T2d = jnp.pad(T2d, ((0, b_pad - B), (0, 0)), constant_values=-1)
    if c_pad != C:
        Pp = jnp.pad(Pp, ((0, c_pad - C), (0, 0)))

    kernel = _make_kernel(alpha, mrg, B, tb, tc, apply_b_mask=(b_pad != B))

    out_struct = jax.ShapeDtypeStruct((n_ct, 1, tc), jnp.float32)
    out_spec = pl.BlockSpec((1, 1, tc), lambda c, b: (c, 0, 0))

    pos_log, neg_log, pos_cnt = pl.pallas_call(
        kernel,
        out_shape=(out_struct, out_struct, out_struct),
        grid_spec=pltpu.PrefetchScalarGridSpec(
            num_scalar_prefetch=0,
            grid=(n_ct, n_bt),
            in_specs=[
                pl.BlockSpec((tb, D), lambda c, b: (b, 0)),   # X tile
                pl.BlockSpec((tc, D), lambda c, b: (c, 0)),   # proxy tile
                pl.BlockSpec((tb, 1), lambda c, b: (b, 0)),   # label tile
            ],
            out_specs=[out_spec, out_spec, out_spec],
            scratch_shapes=[pltpu.VMEM((tc, D), jnp.bfloat16)],   # cached Pn
        ),
        compiler_params=pltpu.CompilerParams(
            dimension_semantics=("parallel", "arbitrary")),
    )(Xp, Pp, T2d)

    # Final tiny scalar combine (once, outside the grid): drop padded classes,
    # count proxies that have >= 1 positive, apply the two divisions.
    pos_log = pos_log.reshape(-1)[:C]
    neg_log = neg_log.reshape(-1)[:C]
    pos_cnt = pos_cnt.reshape(-1)[:C]
    num_valid = jnp.sum((pos_cnt > 0.0).astype(jnp.float32))
    # NOTE: like the PyTorch reference, this divides by zero (-> nan/inf) if no
    # class in the batch has a positive sample.
    pos_term = jnp.sum(pos_log) / num_valid
    neg_term = jnp.sum(neg_log) / float(C)
    return pos_term + neg_term


def _reference(X, T, P, mrg=0.1, alpha=32):
    """Pure-JAX (f32) reference of the PyTorch forward, for sanity checking."""
    def l2n(v):
        return v / jnp.sqrt(jnp.sum(v * v, axis=1, keepdims=True) + 1e-12)
    cos = l2n(X) @ l2n(P).T
    C = P.shape[0]
    oh = jax.nn.one_hot(T, C, dtype=jnp.float32)
    pos_exp = jnp.exp(-alpha * (cos - mrg))
    neg_exp = jnp.exp(alpha * (cos + mrg))
    p_sim = jnp.sum(jnp.where(oh == 1, pos_exp, 0.0), axis=0)
    n_sim = jnp.sum(jnp.where(oh == 0, neg_exp, 0.0), axis=0)
    nvalid = jnp.sum((jnp.sum(oh, axis=0) != 0).astype(jnp.float32))
    return jnp.sum(jnp.log(1 + p_sim)) / nvalid + jnp.sum(jnp.log(1 + n_sim)) / C


if __name__ == "__main__":
    key = jax.random.PRNGKey(0)
    k1, k2, k3, k4, k5, k6 = jax.random.split(key, 6)

    # --- test 1: module-sized toy shapes (single grid cell) ---
    nb_classes, sz_embed, batch = 8, 32, 8
    X = jax.random.normal(k1, (batch, sz_embed), dtype=jnp.float32)
    T = jax.random.randint(k2, (batch,), 0, nb_classes, dtype=jnp.int32)
    # kaiming_normal_ with mode='fan_out' on (nb_classes, sz_embed): std = sqrt(2/nb_classes)
    std = math.sqrt(2.0 / nb_classes)
    proxies = std * jax.random.normal(k3, (nb_classes, sz_embed), dtype=jnp.float32)

    loss = proxy_anchor_loss(X, T, proxies, mrg=0.1, alpha=32)
    jax.block_until_ready(loss)
    ref = _reference(X, T, proxies, mrg=0.1, alpha=32)
    # bf16 MXU operands -> ~1e-3 error in cos, amplified by exp(alpha*...); loose tolerance.
    assert jnp.allclose(loss, ref, rtol=5e-2, atol=5e-2), (loss, ref)

    # --- test 2: non-aligned shapes + forced small tiles (exercises the
    #     (C_tiles, B_tiles) grid, batch-padding mask, multi-step B reduction,
    #     and the per-C-tile cached proxy normalization) ---
    nb_classes2, sz_embed2, batch2 = 200, 32, 20
    X2 = jax.random.normal(k4, (batch2, sz_embed2), dtype=jnp.float32)
    T2 = jax.random.randint(k5, (batch2,), 0, nb_classes2, dtype=jnp.int32)
    std2 = math.sqrt(2.0 / nb_classes2)
    proxies2 = std2 * jax.random.normal(k6, (nb_classes2, sz_embed2), dtype=jnp.float32)

    loss2 = proxy_anchor_loss(X2, T2, proxies2, mrg=0.1, alpha=32,
                              tile_b=8, tile_c=128)
    jax.block_until_ready(loss2)
    ref2 = _reference(X2, T2, proxies2, mrg=0.1, alpha=32)
    assert jnp.allclose(loss2, ref2, rtol=5e-2, atol=5e-2), (loss2, ref2)

    print("KERNEL_OK")
</pallas_src>

<mosaic_0001>
module attributes {stable_mosaic.version = 11 : i64} {
  func.func @kernel(%arg0: i32, %arg1: i32, %arg2: memref<8x32xf32, #tpu.memory_space<vmem>>, %arg3: memref<128x32xf32, #tpu.memory_space<vmem>>, %arg4: memref<8x1xi32, #tpu.memory_space<vmem>>, %arg5: memref<1x1x128xf32, #tpu.memory_space<vmem>>, %arg6: memref<1x1x128xf32, #tpu.memory_space<vmem>>, %arg7: memref<1x1x128xf32, #tpu.memory_space<vmem>>, %arg8: memref<128x32xbf16, #tpu.memory_space<vmem>>) attributes {dimension_semantics = [#tpu.dimension_semantics<parallel>, #tpu.dimension_semantics<arbitrary>], iteration_bounds = array<i64: 1, 1>, scalar_prefetch = 0 : i64, scratch_operands = 1 : i64, tpu.core_type = #tpu.core_type<tc>, window_params = [{transform_indices = @transform_0, window_bounds = array<i64: 8, 32>}, {transform_indices = @transform_1, window_bounds = array<i64: 128, 32>}, {transform_indices = @transform_2, window_bounds = array<i64: 8, 1>}, {transform_indices = @transform_3, window_bounds = array<i64: 1, 1, 128>}, {transform_indices = @transform_4, window_bounds = array<i64: 1, 1, 128>}, {transform_indices = @transform_5, window_bounds = array<i64: 1, 1, 128>}]} {
    %c0_i32 = arith.constant 0 : i32
    %0 = arith.cmpi eq, %arg1, %c0_i32 : i32
    %1 = arith.extui %0 : i1 to i32
    %c0_i32_0 = arith.constant 0 : i32
    %2 = arith.cmpi ne, %1, %c0_i32_0 : i32
    scf.if %2 {
      %cst_38 = arith.constant 0.000000e+00 : f32
      %61 = vector.broadcast %cst_38 : f32 to vector<1x1x128xf32>
      %c0_39 = arith.constant 0 : index
      %c0_40 = arith.constant 0 : index
      %c0_41 = arith.constant 0 : index
      %62 = vector.load %arg5[%c0_39, %c0_40, %c0_41] : memref<1x1x128xf32, #tpu.memory_space<vmem>>, vector<1x1x128xf32>
      tpu.vector_store %arg5[%c0_39, %c0_40, %c0_41], %61 {strides = array<i32>} : memref<1x1x128xf32, #tpu.memory_space<vmem>>, vector<1x1x128xf32>,
      %cst_42 = arith.constant 0.000000e+00 : f32
      %63 = vector.broadcast %cst_42 : f32 to vector<1x1x128xf32>
      %c0_43 = arith.constant 0 : index
      %c0_44 = arith.constant 0 : index
      %c0_45 = arith.constant 0 : index
      %64 = vector.load %arg6[%c0_43, %c0_44, %c0_45] : memref<1x1x128xf32, #tpu.memory_space<vmem>>, vector<1x1x128xf32>
      tpu.vector_store %arg6[%c0_43, %c0_44, %c0_45], %63 {strides = array<i32>} : memref<1x1x128xf32, #tpu.memory_space<vmem>>, vector<1x1x128xf32>,
      %cst_46 = arith.constant 0.000000e+00 : f32
      %65 = vector.broadcast %cst_46 : f32 to vector<1x1x128xf32>
      %c0_47 = arith.constant 0 : index
      %c0_48 = arith.constant 0 : index
      %c0_49 = arith.constant 0 : index
      %66 = vector.load %arg7[%c0_47, %c0_48, %c0_49] : memref<1x1x128xf32, #tpu.memory_space<vmem>>, vector<1x1x128xf32>
      tpu.vector_store %arg7[%c0_47, %c0_48, %c0_49], %65 {strides = array<i32>} : memref<1x1x128xf32, #tpu.memory_space<vmem>>, vector<1x1x128xf32>,
      %c0_50 = arith.constant 0 : index
      %c0_51 = arith.constant 0 : index
      %67 = vector.load %arg3[%c0_50, %c0_51] : memref<128x32xf32, #tpu.memory_space<vmem>>, vector<128x32xf32>
      %68 = arith.mulf %67, %67 : vector<128x32xf32>
      %cst_52 = arith.constant dense<0.000000e+00> : vector<128xf32>
      %69 = vector.multi_reduction <add>, %68, %cst_52 [1] : vector<128x32xf32> to vector<128xf32>
      %70 = vector.shape_cast %69 : vector<128xf32> to vector<128x1xf32>
      %cst_53 = arith.constant 9.99999996E-13 : f32
      %71 = vector.broadcast %cst_53 : f32 to vector<128x1xf32>
      %72 = arith.addf %70, %71 : vector<128x1xf32>
      %73 = math.rsqrt %72 : vector<128x1xf32>
      %74 = vector.broadcast %73 : vector<128x1xf32> to vector<128x32xf32>
      %75 = arith.mulf %67, %74 : vector<128x32xf32>
      %76 = arith.truncf %75 : vector<128x32xf32> to vector<128x32xbf16>
      %c0_54 = arith.constant 0 : index
      %c0_55 = arith.constant 0 : index
      %77 = vector.load %arg8[%c0_54, %c0_55] : memref<128x32xbf16, #tpu.memory_space<vmem>>, vector<128x32xbf16>
      tpu.vector_store %arg8[%c0_54, %c0_55], %76 {strides = array<i32>} : memref<128x32xbf16, #tpu.memory_space<vmem>>, vector<128x32xbf16>,
    } else {
    }
    %c0 = arith.constant 0 : index
    %c0_1 = arith.constant 0 : index
    %3 = vector.load %arg2[%c0, %c0_1] : memref<8x32xf32, #tpu.memory_space<vmem>>, vector<8x32xf32>
    %c0_2 = arith.constant 0 : index
    %c0_3 = arith.constant 0 : index
    %4 = vector.load %arg4[%c0_2, %c0_3] : memref<8x1xi32, #tpu.memory_space<vmem>>, vector<8x1xi32>
    %5 = arith.mulf %3, %3 : vector<8x32xf32>
    %cst = arith.constant dense<0.000000e+00> : vector<8xf32>
    %6 = vector.multi_reduction <add>, %5, %cst [1] : vector<8x32xf32> to vector<8xf32>
    %7 = vector.shape_cast %6 : vector<8xf32> to vector<8x1xf32>
    %cst_4 = arith.constant 9.99999996E-13 : f32
    %8 = vector.broadcast %cst_4 : f32 to vector<8x1xf32>
    %9 = arith.addf %7, %8 : vector<8x1xf32>
    %10 = math.rsqrt %9 : vector<8x1xf32>
    %11 = vector.broadcast %10 : vector<8x1xf32> to vector<8x32xf32>
    %12 = arith.mulf %3, %11 : vector<8x32xf32>
    %13 = arith.truncf %12 : vector<8x32xf32> to vector<8x32xbf16>
    %c0_5 = arith.constant 0 : index
    %c0_6 = arith.constant 0 : index
    %14 = vector.load %arg8[%c0_5, %c0_6] : memref<128x32xbf16, #tpu.memory_space<vmem>>, vector<128x32xbf16>
    %cst_7 = arith.constant dense<0.000000e+00> : vector<8x128xf32>
    %15 = tpu.matmul %13, %14, %cst_7 {dimension_numbers = #tpu.dot_dimension_numbers<[1], [1], [0], [0], [0, 0, 1, 0], [], []>} : vector<8x32xbf16>, vector<128x32xbf16>, vector<8x128xf32> -> vector<8x128xf32>
    %c128_i32 = arith.constant 128 : i32
    %16 = arith.muli %arg0, %c128_i32 : i32
    %17 = tpu.iota {dimensions = array<i32: 1>} : vector<1x128xi32>
    %18 = vector.broadcast %16 : i32 to vector<1x128xi32>
    %19 = arith.addi %18, %17 : vector<1x128xi32>
    %20 = vector.broadcast %19 : vector<1x128xi32> to vector<8x128xi32>
    %21 = vector.broadcast %4 : vector<8x1xi32> to vector<8x128xi32>
    %22 = arith.cmpi eq, %20, %21 : vector<8x128xi32>
    %cst_8 = arith.constant dense<true> : vector<8x128xi1>
    %23 = arith.xori %22, %cst_8 : vector<8x128xi1>
    %cst_9 = arith.constant 1.000000e-01 : f32
    %24 = vector.broadcast %cst_9 : f32 to vector<8x128xf32>
    %25 = arith.subf %15, %24 : vector<8x128xf32>
    %cst_10 = arith.constant -3.200000e+01 : f32
    %26 = vector.broadcast %cst_10 : f32 to vector<8x128xf32>
    %27 = arith.mulf %26, %25 : vector<8x128xf32>
    %cst_11 = arith.constant 1.000000e-01 : f32
    %28 = vector.broadcast %cst_11 : f32 to vector<8x128xf32>
    %29 = arith.addf %15, %28 : vector<8x128xf32>
    %cst_12 = arith.constant 3.200000e+01 : f32
    %30 = vector.broadcast %cst_12 : f32 to vector<8x128xf32>
    %31 = arith.mulf %30, %29 : vector<8x128xf32>
    %32 = arith.select %22, %27, %31 : vector<8x128xi1>, vector<8x128xf32>
    %33 = math.exp %32 : vector<8x128xf32>
    %cst_13 = arith.constant 0.000000e+00 : f32
    %34 = vector.broadcast %cst_13 : f32 to vector<8x128xf32>
    %35 = arith.select %22, %33, %34 : vector<8x128xi1>, vector<8x128xf32>
    %cst_14 = arith.constant dense<0.000000e+00> : vector<128xf32>
    %36 = vector.multi_reduction <add>, %35, %cst_14 [0] : vector<8x128xf32> to vector<128xf32>
    %37 = vector.shape_cast %36 : vector<128xf32> to vector<1x128xf32>
    %cst_15 = arith.constant 0.000000e+00 : f32
    %38 = vector.broadcast %cst_15 : f32 to vector<8x128xf32>
    %39 = arith.select %23, %33, %38 : vector<8x128xi1>, vector<8x128xf32>
    %cst_16 = arith.constant dense<0.000000e+00> : vector<128xf32>
    %40 = vector.multi_reduction <add>, %39, %cst_16 [0] : vector<8x128xf32> to vector<128xf32>
    %41 = vector.shape_cast %40 : vector<128xf32> to vector<1x128xf32>
    %42 = arith.extui %22 : vector<8x128xi1> to vector<8x128xi32>
    %43 = arith.sitofp %42 : vector<8x128xi32> to vector<8x128xf32>
    %cst_17 = arith.constant dense<0.000000e+00> : vector<128xf32>
    %44 = vector.multi_reduction <add>, %43, %cst_17 [0] : vector<8x128xf32> to vector<128xf32>
    %45 = vector.shape_cast %44 : vector<128xf32> to vector<1x128xf32>
    %c0_18 = arith.constant 0 : index
    %c0_19 = arith.constant 0 : index
    %c0_20 = arith.constant 0 : index
    %46 = vector.load %arg5[%c0_18, %c0_19, %c0_20] : memref<1x1x128xf32, #tpu.memory_space<vmem>>, vector<1x1x128xf32>
    %47 = vector.shape_cast %37 : vector<1x128xf32> to vector<1x1x128xf32>
    %48 = arith.addf %46, %47 : vector<1x1x128xf32>
    %c0_21 = arith.constant 0 : index
    %c0_22 = arith.constant 0 : index
    %c0_23 = arith.constant 0 : index
    %49 = vector.load %arg5[%c0_21, %c0_22, %c0_23] : memref<1x1x128xf32, #tpu.memory_space<vmem>>, vector<1x1x128xf32>
    tpu.vector_store %arg5[%c0_21, %c0_22, %c0_23], %48 {strides = array<i32>} : memref<1x1x128xf32, #tpu.memory_space<vmem>>, vector<1x1x128xf32>,
    %c0_24 = arith.constant 0 : index
    %c0_25 = arith.constant 0 : index
    %c0_26 = arith.constant 0 : index
    %50 = vector.load %arg6[%c0_24, %c0_25, %c0_26] : memref<1x1x128xf32, #tpu.memory_space<vmem>>, vector<1x1x128xf32>
    %51 = vector.shape_cast %41 : vector<1x128xf32> to vector<1x1x128xf32>
    %52 = arith.addf %50, %51 : vector<1x1x128xf32>
    %c0_27 = arith.constant 0 : index
    %c0_28 = arith.constant 0 : index
    %c0_29 = arith.constant 0 : index
    %53 = vector.load %arg6[%c0_27, %c0_28, %c0_29] : memref<1x1x128xf32, #tpu.memory_space<vmem>>, vector<1x1x128xf32>
    tpu.vector_store %arg6[%c0_27, %c0_28, %c0_29], %52 {strides = array<i32>} : memref<1x1x128xf32, #tpu.memory_space<vmem>>, vector<1x1x128xf32>,
    %c0_30 = arith.constant 0 : index
    %c0_31 = arith.constant 0 : index
    %c0_32 = arith.constant 0 : index
    %54 = vector.load %arg7[%c0_30, %c0_31, %c0_32] : memref<1x1x128xf32, #tpu.memory_space<vmem>>, vector<1x1x128xf32>
    %55 = vector.shape_cast %45 : vector<1x128xf32> to vector<1x1x128xf32>
    %56 = arith.addf %54, %55 : vector<1x1x128xf32>
    %c0_33 = arith.constant 0 : index
    %c0_34 = arith.constant 0 : index
    %c0_35 = arith.constant 0 : index
    %57 = vector.load %arg7[%c0_33, %c0_34, %c0_35] : memref<1x1x128xf32, #tpu.memory_space<vmem>>, vector<1x1x128xf32>
    tpu.vector_store %arg7[%c0_33, %c0_34, %c0_35], %56 {strides = array<i32>} : memref<1x1x128xf32, #tpu.memory_space<vmem>>, vector<1x1x128xf32>,
    %c0_i32_36 = arith.constant 0 : i32
    %58 = arith.cmpi eq, %arg1, %c0_i32_36 : i32
    %59 = arith.extui %58 : i1 to i32
    %c0_i32_37 = arith.constant 0 : i32
    %60 = arith.cmpi ne, %59, %c0_i32_37 : i32
    scf.if %60 {
      %c0_38 = arith.constant 0 : index
      %c0_39 = arith.constant 0 : index
      %c0_40 = arith.constant 0 : index
      %61 = vector.load %arg5[%c0_38, %c0_39, %c0_40] : memref<1x1x128xf32, #tpu.memory_space<vmem>>, vector<1x1x128xf32>
      %cst_41 = arith.constant 1.000000e+00 : f32
      %62 = vector.broadcast %cst_41 : f32 to vector<1x1x128xf32>
      %63 = arith.addf %62, %61 : vector<1x1x128xf32>
      %64 = math.log %63 : vector<1x1x128xf32>
      %c0_42 = arith.constant 0 : index
      %c0_43 = arith.constant 0 : index
      %c0_44 = arith.constant 0 : index
      %65 = vector.load %arg5[%c0_42, %c0_43, %c0_44] : memref<1x1x128xf32, #tpu.memory_space<vmem>>, vector<1x1x128xf32>
      tpu.vector_store %arg5[%c0_42, %c0_43, %c0_44], %64 {strides = array<i32>} : memref<1x1x128xf32, #tpu.memory_space<vmem>>, vector<1x1x128xf32>,
      %c0_45 = arith.constant 0 : index
      %c0_46 = arith.constant 0 : index
      %c0_47 = arith.constant 0 : index
      %66 = vector.load %arg6[%c0_45, %c0_46, %c0_47] : memref<1x1x128xf32, #tpu.memory_space<vmem>>, vector<1x1x128xf32>
      %cst_48 = arith.constant 1.000000e+00 : f32
      %67 = vector.broadcast %cst_48 : f32 to vector<1x1x128xf32>
      %68 = arith.addf %67, %66 : vector<1x1x128xf32>
      %69 = math.log %68 : vector<1x1x128xf32>
      %c0_49 = arith.constant 0 : index
      %c0_50 = arith.constant 0 : index
      %c0_51 = arith.constant 0 : index
      %70 = vector.load %arg6[%c0_49, %c0_50, %c0_51] : memref<1x1x128xf32, #tpu.memory_space<vmem>>, vector<1x1x128xf32>
      tpu.vector_store %arg6[%c0_49, %c0_50, %c0_51], %69 {strides = array<i32>} : memref<1x1x128xf32, #tpu.memory_space<vmem>>, vector<1x1x128xf32>,
    } else {
    }
    return
  }
  func.func @transform_0(%arg0: i32, %arg1: i32) -> (i32, i32) {
    %c0_i32 = arith.constant 0 : i32
    %c0_i32_0 = arith.constant 0 : i32
    return %arg1, %c0_i32 : i32, i32
  }
  func.func @transform_1(%arg0: i32, %arg1: i32) -> (i32, i32) {
    %c0_i32 = arith.constant 0 : i32
    %c0_i32_0 = arith.constant 0 : i32
    return %arg0, %c0_i32 : i32, i32
  }
  func.func @transform_2(%arg0: i32, %arg1: i32) -> (i32, i32) {
    %c0_i32 = arith.constant 0 : i32
    %c0_i32_0 = arith.constant 0 : i32
    return %arg1, %c0_i32 : i32, i32
  }
  func.func @transform_3(%arg0: i32, %arg1: i32) -> (i32, i32, i32) {
    %c0_i32 = arith.constant 0 : i32
    %c0_i32_0 = arith.constant 0 : i32
    %c0_i32_1 = arith.constant 0 : i32
    return %arg0, %c0_i32, %c0_i32_0 : i32, i32, i32
  }
  func.func @transform_4(%arg0: i32, %arg1: i32) -> (i32, i32, i32) {
    %c0_i32 = arith.constant 0 : i32
    %c0_i32_0 = arith.constant 0 : i32
    %c0_i32_1 = arith.constant 0 : i32
    return %arg0, %c0_i32, %c0_i32_0 : i32, i32, i32
  }
  func.func @transform_5(%arg0: i32, %arg1: i32) -> (i32, i32, i32) {
    %c0_i32 = arith.constant 0 : i32
    %c0_i32_0 = arith.constant 0 : i32
    %c0_i32_1 = arith.constant 0 : i32
    return %arg0, %c0_i32, %c0_i32_0 : i32, i32, i32
  }
}

</mosaic_0001>

<bundles_post_ra>
// kernel: tpu_custom_call.1
= control target key start
LH: loop header
LB: loop body
LE: loop exit
PB: predicated region body
PF: predicated region fallthrough
CT: control target
= control target key end

     0   :  { %11 = vsyncpa [#allocation4], 0  ;;  %vm59_vm0 = vcmask 261120   ;;  %s790_s0 = inlined_call_operand.vmem [shape: f32[8,32], index: 0, kind: input, shape index: {}]   ;;  %s791_s1 = inlined_call_operand.vmem [shape: f32[128,32], index: 1, kind: input, shape index: {}]   ;;  %s792_s2 = inlined_call_operand.vmem [shape: s32[8,1], index: 2, kind: input, shape index: {}]   ;;  %s793_s3 = inlined_call_operand.hbm [shape: f32[1,1,128], index: 3, kind: output, shape index: {0}]   ;;  %s794_s4 = inlined_call_operand.hbm [shape: f32[1,1,128], index: 4, kind: output, shape index: {1}]   ;;  %s795_s5 = inlined_call_operand.hbm [shape: f32[1,1,128], index: 5, kind: output, shape index: {2}]  }
   0x1   :  { %v551_v0 = vld [vmem:[%s791_s1] sm:$0xff]  ;;  %v556_v1 = vld [vmem:[%s791_s1 + $0x10] sm:$0xff]  ;;  %v561_v2 = vld [vmem:[%s791_s1 + $0x8] sm:$0xff] }
   0x2   :  { %v43_v3 = vmul.f32 %v551_v0, %v551_v0  ;;  %v45_v4 = vmul.f32 %v556_v1, %v556_v1  ;;  %v44_v5 = vmul.f32 %v561_v2, %v561_v2  ;;  %v572_v6 = vld [vmem:[%s791_s1 + $0x18] sm:$0xff]  ;;  %v579_v8 = vld [vmem:[%s791_s1 + $0x28] sm:$0xff]  ;;  %v584_v9 = vld [vmem:[%s791_s1 + $0x20] sm:$0xff] }
   0x3   :  { %v46_v7 = vmul.f32 %v572_v6, %v572_v6  ;;  %v48_v14 = vmul.f32 %v579_v8, %v579_v8  ;;  %v47_v15 = vmul.f32 %v584_v9, %v584_v9 }
   0x4   :  { %v60_v10 = vsel %vm59_vm0, %v43_v3, 0.0  ;;  %v66_v11 = vsel %vm59_vm0, %v45_v4, 0.0  ;;  %v63_v12 = vsel %vm59_vm0, %v44_v5, 0.0 }
   0x5   :  { %61 = vadd.xlane.f32.xlu0 %v60_v10  ;;  %67 = vadd.xlane.f32.xlu1 %v66_v11  ;;  %v69_v13 = vsel %vm59_vm0, %v46_v7, 0.0 }
   0x6   :  { %12 = vsyncpa [#allocation6], 0  ;;  %v597_v16 = vld [vmem:[%s791_s1 + $0x38] sm:$0xff]  ;;  %v602_v17 = vld [vmem:[%s791_s1 + $0x30] sm:$0xff]  ;;  %v75_v18 = vsel %vm59_vm0, %v48_v14, 0.0  ;;  %v72_v19 = vsel %vm59_vm0, %v47_v15, 0.0 }
   0x7   :  { %v50_v20 = vmul.f32 %v597_v16, %v597_v16  ;;  %v49_v21 = vmul.f32 %v602_v17, %v602_v17  ;;  %v613_v22 = vld [vmem:[%s791_s1 + $0x48] sm:$0xff]  ;;  %v618_v23 = vld [vmem:[%s791_s1 + $0x40] sm:$0xff]  ;;  %v629_v28 = vld [vmem:[%s791_s1 + $0x58] sm:$0xff]  ;;  %v511_v51 = vmov 0.0   ;;  %vm512_vm1 = vmmov 0   ;;  %s516_s28 = smov [#allocation3]  }
   0x8   :  { %v52_v26 = vmul.f32 %v613_v22, %v613_v22  ;;  %v51_v27 = vmul.f32 %v618_v23, %v618_v23  ;;  %v634_v29 = vld [vmem:[%s791_s1 + $0x50] sm:$0xff]  ;;  %v54_v32 = vmul.f32 %v629_v28, %v629_v28  ;;  %v645_v34 = vld [vmem:[%s791_s1 + $0x68] sm:$0xff]  ;;  %v650_v35 = vld [vmem:[%s791_s1 + $0x60] sm:$0xff]  ;;  %372 = vmatprep.subr.bf16.mxu0 %v511_v51  ;;  %24 = vst [vmem:[#allocation3] sm:$0x1] %v511_v51  ;;  %v513_v53 = vmov 0  }
   0x9   :  { %64 = vadd.xlane.f32.xlu0 %v63_v12  ;;  %70 = vadd.xlane.f32.xlu1 %v69_v13  ;;  %v81_v24 = vsel %vm59_vm0, %v50_v20, 0.0  ;;  %v78_v25 = vsel %vm59_vm0, %v49_v21, 0.0  ;;  %v53_v33 = vmul.f32 %v634_v29, %v634_v29  ;;  %v56_v38 = vmul.f32 %v645_v34, %v645_v34  ;;  %v661_v40 = vld [vmem:[%s791_s1 + $0x78] sm:$0xff]  ;;  %v666_v41 = vld [vmem:[%s791_s1 + $0x70] sm:$0xff]  ;;  %v677_v46 = vld [vmem:[%s790_s0] sm:$0xff]  ;;  %s325_s29 = sshll.u32 %s516_s28, 4  ;;  %s738_s29 = int_to_ptr.vmem [resolvable:$true] %s325_s29 }
   0xa   :  { %v87_v30 = vsel %vm59_vm0, %v52_v26, 0.0  ;;  %v84_v31 = vsel %vm59_vm0, %v51_v27, 0.0  ;;  %v93_v36 = vsel %vm59_vm0, %v54_v32, 0.0  ;;  %v55_v39 = vmul.f32 %v650_v35, %v650_v35  ;;  %25 = vst [vmem:[#allocation5] sm:$0x1] %v511_v51  ;;  %388 = vmatprep.mubr.msk.bf16.mxu0 %vm512_vm1, %v511_v51  ;;  %v173_v52 = vld [vmem:[%s792_s2] sm:$0xff]  ;;  %399 = vset.pattern.permute.xlu1 %v513_v53 }
   0xb   :  { %v90_v37 = vsel %vm59_vm0, %v53_v33, 0.0  ;;  %v99_v42 = vsel %vm59_vm0, %v56_v38, 0.0  ;;  %v58_v44 = vmul.f32 %v661_v40, %v661_v40  ;;  %v57_v45 = vmul.f32 %v666_v41, %v666_v41  ;;  %26 = vst [vmem:[#allocation7] sm:$0x1] %v511_v51  ;;  %400 = vset.pattern.permute.xlu0 %v513_v53  ;;  %s515_s2 = smov [#allocation5]   ;;  %s517_s30 = smov [#allocation7]  }
   0xc   :  { %v96_v43 = vsel %vm59_vm0, %v55_v39, 0.0  ;;  %v174_v49 = vmul.f32 %v677_v46, %v677_v46  ;;  %vm514_vm3 = vmmov 1   ;;  %s335_s27 = sshll.u32 %s515_s2, 4  ;;  %s345_s6 = sshll.u32 %s517_s30, 4  ;;  %s336_s27 = int_to_ptr.vmem [resolvable:$true] %s335_s27  ;;  %s740_s6 = int_to_ptr.vmem [resolvable:$true] %s345_s6 }
   0xd   :  { %76 = vadd.xlane.f32.xlu1 %v75_v18  ;;  %73 = vadd.xlane.f32.xlu0 %v72_v19  ;;  %v105_v47 = vsel %vm59_vm0, %v58_v44, 0.0  ;;  %v102_v48 = vsel %vm59_vm0, %v57_v45, 0.0  ;;  %s441_s7 = scalar_lea.vmem %s336_s27, 16  ;;  %s445_s8 = scalar_lea.vmem %s336_s27, 32 }
   0xe   :  { %v176_v50 = vsel %vm59_vm0, %v174_v49, 0.0  ;;  %p442_p0 = scmp.ne.s32.totalorder %s336_s27, %s441_s7  ;;  %p446_p1 = scmp.lt.s32.totalorder %s336_s27, %s336_s27 }
   0xf   :  { %p447_p2 = scmp.lt.s32.totalorder %s445_s8, %s441_s7 }
  0x11   :  { %82 = vadd.xlane.f32.xlu1 %v81_v24  ;;  %79 = vadd.xlane.f32.xlu0 %v78_v25  ;;  %p448_p3 = por %p447_p2, %p446_p1 }
  0x13   :  { %p449_p4 = pnand %p448_p3, %p442_p0 }
  0x15   :  { %88 = vadd.xlane.f32.xlu1 %v87_v30  ;;  %85 = vadd.xlane.f32.xlu0 %v84_v31 }
  0x19   :  { %94 = vadd.xlane.f32.xlu1 %v93_v36  ;;  %91 = vadd.xlane.f32.xlu0 %v90_v37 }
  0x1d   :  { %100 = vadd.xlane.f32.xlu1 %v99_v42  ;;  %97 = vadd.xlane.f32.xlu0 %v96_v43 }
  0x21   :  { %106 = vadd.xlane.f32.xlu1 %v105_v47  ;;  %103 = vadd.xlane.f32.xlu0 %v102_v48 }
  0x25   :  { %177 = vadd.xlane.f32.xlu0 %v176_v50 }
  0x32   :  { %264 = vperm.xlu1 %399, %v173_v52  }
  0x92   :  { %v62_v54 = vpop.xlane.xlu0 %61  ;;  %v68_v55 = vpop.xlane.xlu1 %67 }
  0x93   :  { %v108_v56 = vadd.f32 1e-12, %v62_v54  ;;  %v110_v57 = vadd.f32 1e-12, %v68_v55 }
  0x95   :  { %401 = vrsqrt.f32 %v110_v57 }
  0x96   :  { %v65_v58 = vpop.xlane.xlu0 %64  ;;  %v71_v59 = vpop.xlane.xlu1 %70  ;;  %403 = vrsqrt.f32 %v108_v56 }
  0x97   :  { %v109_v60 = vadd.f32 1e-12, %v65_v58  ;;  %v111_v61 = vadd.f32 1e-12, %v71_v59 }
  0x99   :  { %405 = vrsqrt.f32 %v109_v60 }
  0x9a   :  { %407 = vrsqrt.f32 %v111_v61  ;;  %v77_v62 = vpop.xlane.xlu1 %76  ;;  %v74_v63 = vpop.xlane.xlu0 %73 }
  0x9b   :  { %v113_v3 = vadd.f32 1e-12, %v77_v62  ;;  %v112_v4 = vadd.f32 1e-12, %v74_v63 }
  0x9d   :  { %409 = vrsqrt.f32 %v113_v3 }
  0x9e   :  { %411 = vrsqrt.f32 %v112_v4  ;;  %v83_v5 = vpop.xlane.xlu1 %82  ;;  %v80_v7 = vpop.xlane.xlu0 %79 }
  0x9f   :  { %v115_v10 = vadd.f32 1e-12, %v83_v5  ;;  %v114_v11 = vadd.f32 1e-12, %v80_v7  ;;  %v402_v12 = vpop.eup %401 }
  0xa0   :  { %v404_v13 = vpop.eup %403  ;;  %v142_v19 = vmul.f32 %v402_v12, %v556_v1 }
  0xa1   :  { %413 = vrsqrt.f32 %v115_v10  ;;  %v140_v25 = vmul.f32 %v404_v13, %v551_v0 }
  0xa2   :  { %415 = vrsqrt.f32 %v114_v11  ;;  %v89_v14 = vpop.xlane.xlu1 %88  ;;  %v86_v15 = vpop.xlane.xlu0 %85 }
  0xa3   :  { %v406_v18 = vpop.eup %405  ;;  %v117_v20 = vadd.f32 1e-12, %v89_v14  ;;  %v116_v21 = vadd.f32 1e-12, %v86_v15 }
  0xa4   :  { %v408_v24 = vpop.eup %407  ;;  %v141_v26 = vmul.f32 %v406_v18, %v561_v2 }
  0xa5   :  { %v143_v27 = vmul.f32 %v408_v24, %v572_v6  ;;  %417 = vrsqrt.f32 %v117_v20 }
  0xa6   :  { %v156_v30 = vpack.c.bf16 %v141_v26, %v140_v25  ;;  %419 = vrsqrt.f32 %v116_v21  ;;  %v95_v31 = vpop.xlane.xlu1 %94  ;;  %v92_v32 = vpop.xlane.xlu0 %91 }
  0xa7   :  { %v410_v33 = vpop.eup %409  ;;  %v157_v36 = vpack.c.bf16 %v143_v27, %v142_v19  ;;  %v119_v37 = vadd.f32 1e-12, %v95_v31  ;;  %v118_v38 = vadd.f32 1e-12, %v92_v32 }
  0xa8   :  { %v412_v39 = vpop.eup %411  ;;  %164 = vst.msk [vmem:[#allocation2] sm:$0xff] %vm59_vm0, %v156_v30  ;;  %v145_v1 = vmul.f32 %v410_v33, %v579_v8  ;;  %v259_v33 = vlaneseq }
  0xa9   :  { %165 = vst.msk [vmem:[#allocation2 + $0x8] sm:$0xff] %vm59_vm0, %v157_v36  ;;  %v144_v0 = vmul.f32 %v412_v39, %v584_v9  ;;  %421 = vrsqrt.f32 %v119_v37 }
  0xaa   :  { %423 = vrsqrt.f32 %v118_v38  ;;  %v101_v2 = vpop.xlane.xlu1 %100  ;;  %v98_v6 = vpop.xlane.xlu0 %97  ;;  %v260_v36 = vand.u32 127, %v259_v33 }
  0xab   :  { %v414_v42 = vpop.eup %413  ;;  %v158_v43 = vpack.c.bf16 %v145_v1, %v144_v0  ;;  %v121_v44 = vadd.f32 1e-12, %v101_v2  ;;  %v120_v45 = vadd.f32 1e-12, %v98_v6 }
  0xac   :  { %v416_v47 = vpop.eup %415  ;;  %v147_v48 = vmul.f32 %v414_v42, %v597_v16 }
  0xad   :  { %166 = vst.msk [vmem:[#allocation2 + $0x10] sm:$0xff] %vm59_vm0, %v158_v43  ;;  %v146_v49 = vmul.f32 %v416_v47, %v602_v17  ;;  %425 = vrsqrt.f32 %v121_v44  ;;  %v303_v43 = vld [vmem:[#allocation7] sm:$0x1] }
  0xae   :  { %427 = vrsqrt.f32 %v120_v45  ;;  %v107_v8 = vpop.xlane.xlu1 %106  ;;  %v104_v50 = vpop.xlane.xlu0 %103 }
  0xaf   :  { %v418_v9 = vpop.eup %417  ;;  %v159_v52 = vpack.c.bf16 %v147_v48, %v146_v49  ;;  %v183_v53 = vld [vmem:[#allocation2] sm:$0xff]  ;;  %v123_v54 = vadd.f32 1e-12, %v107_v8  ;;  %v122_v55 = vadd.f32 1e-12, %v104_v50 }
  0xb0   :  { %v420_v56 = vpop.eup %419  ;;  %v195_v57 = vsel %vm59_vm0, %v183_v53, 0  ;;  %v149_v58 = vmul.f32 %v418_v9, %v613_v22  ;;  %v184_v62 = vld [vmem:[#allocation2 + $0x8] sm:$0xff] }
  0xb1   :  { %167 = vst.msk [vmem:[#allocation2 + $0x18] sm:$0xff] %vm59_vm0, %v159_v52  ;;  %373 = vmatpush3.bf16.xpose.msra.mxu0 %v195_v57  ;;  %v148_v16 = vmul.f32 %v420_v56, %v618_v23  ;;  %429 = vrsqrt.f32 %v123_v54  ;;  %v198_v5 = vsel %vm59_vm0, %v184_v62, 0 }
  0xb2   :  { %374 = vmatprep.subr.bf16.mxu0 %v511_v51  ;;  %431 = vrsqrt.f32 %v122_v55  ;;  %v178_v19 = vpop.xlane.xlu0 %177  ;;  %v265_v37 = vpop.permute.xlu1 %264 }
  0xb3   :  { %v422_v17 = vpop.eup %421  ;;  %v160_v59 = vpack.c.bf16 %v149_v58, %v148_v16  ;;  %v179_v21 = vadd.f32 1e-12, %v178_v19  ;;  %vm266_vm2 = vcmp.eq.s32.totalorder %v260_v36, %v265_v37 }
  0xb4   :  { %v424_v60 = vpop.eup %423  ;;  %v151_v61 = vmul.f32 %v422_v17, %v629_v28  ;;  %v185_v10 = vld [vmem:[#allocation2 + $0x10] sm:$0xff]  ;;  %v362_v38 = vsel %vm266_vm2, 1.0, %v511_v51  ;;  %vm267_vm4 = vmxor %vm266_vm2, %vm514_vm3 }
  0xb5   :  { %168 = vst.msk [vmem:[#allocation2 + $0x20] sm:$0xff] %vm59_vm0, %v160_v59  ;;  %v150_v63 = vmul.f32 %v424_v60, %v634_v29  ;;  %v201_v14 = vsel %vm59_vm0, %v185_v10, 0  ;;  %433 = vrsqrt.f32 %v179_v21  ;;  %v291_v39 = vrot.slane %v362_v38, 4 }
  0xb7   :  { %v426_v22 = vpop.eup %425  ;;  %v161_v3 = vpack.c.bf16 %v151_v61, %v150_v63  ;;  %v292_v1 = vadd.f32 %v362_v38, %v291_v39 }
  0xb8   :  { %v428_v4 = vpop.eup %427  ;;  %v153_v23 = vmul.f32 %v426_v22, %v645_v34  ;;  %v300_v22 = vld [vmem:[#allocation5] sm:$0x1] }
  0xb9   :  { %375 = vmatpush3.bf16.xpose.msra.mxu0 %v198_v5  ;;  %169 = vst.msk [vmem:[#allocation2 + $0x28] sm:$0xff] %vm59_vm0, %v161_v3  ;;  %v152_v7 = vmul.f32 %v428_v4, %v650_v35  ;;  %v186_v35 = vld [vmem:[#allocation2 + $0x18] sm:$0xff]  ;;  %v293_v0 = vrot.slane %v292_v1, 2  ;;  %v297_v3 = vld [vmem:[#allocation3] sm:$0x1] }
  0xba   :  { %376 = vmatprep.subr.bf16.mxu0 %v511_v51  ;;  %v204_v15 = vsel %vm59_vm0, %v186_v35, 0 }
  0xbb   :  { %v430_v28 = vpop.eup %429  ;;  %v162_v11 = vpack.c.bf16 %v153_v23, %v152_v7  ;;  %v294_v2 = vadd.f32 %v293_v0, %v292_v1 }
  0xbc   :  { %v432_v12 = vpop.eup %431  ;;  %v155_v29 = vmul.f32 %v430_v28, %v661_v40  ;;  %v187_v18 = vld [vmem:[#allocation2 + $0x20] sm:$0xff] }
  0xbd   :  { %170 = vst.msk [vmem:[#allocation2 + $0x30] sm:$0xff] %vm59_vm0, %v162_v11  ;;  %v154_v13 = vmul.f32 %v432_v12, %v666_v41  ;;  %v207_v40 = vsel %vm59_vm0, %v187_v18, 0  ;;  %v295_v6 = vrot.slane %v294_v2, 1 }
  0xbf   :  { %v163_v34 = vpack.c.bf16 %v155_v29, %v154_v13  ;;  %v434_v27 = vpop.eup %433  ;;  %v296_v42 = vadd.f32 %v295_v6, %v294_v2 }
  0xc0   :  { %v188_v41 = vld [vmem:[#allocation2 + $0x28] sm:$0xff]  ;;  %v181_v31 = vmul.f32 %v434_v27, %v677_v46 }
  0xc1   :  { %377 = vmatpush3.bf16.xpose.msra.mxu0 %v201_v14  ;;  %171 = vst.msk [vmem:[#allocation2 + $0x38] sm:$0xff] %vm59_vm0, %v163_v34  ;;  %v210_v20 = vsel %vm59_vm0, %v188_v41, 0  ;;  %v304_v44 = vadd.f32 %v303_v43, %v296_v42 }
  0xc2   :  { %378 = vmatprep.subr.bf16.mxu0 %v511_v51  ;;  %v182_v32 = vpack.c.bf16 %v181_v31, %v181_v31 }
  0xc3   :  { %305 = vst [vmem:[#allocation7] sm:$0x1] %v304_v44 }
  0xc4   :  { %v189_v24 = vld [vmem:[#allocation2 + $0x30] sm:$0xff] }
  0xc5   :  { %v213_v25 = vsel %vm59_vm0, %v189_v24, 0 }
  0xc8   :  { %v190_v26 = vld [vmem:[#allocation2 + $0x38] sm:$0xff] }
  0xc9   :  { %379 = vmatpush3.bf16.xpose.msra.mxu0 %v204_v15  ;;  %v216_v30 = vsel %vm59_vm0, %v190_v26, 0 }
  0xca   :  { %380 = vmatprep.subr.bf16.mxu0 %v511_v51 }
  0xd1   :  { %381 = vmatpush3.bf16.xpose.msra.mxu0 %v207_v40 }
  0xd2   :  { %382 = vmatprep.subr.bf16.mxu0 %v511_v51 }
  0xd9   :  { %383 = vmatpush3.bf16.xpose.msra.mxu0 %v210_v20 }
  0xda   :  { %384 = vmatprep.subr.bf16.mxu0 %v511_v51 }
  0xe1   :  { %385 = vmatpush3.bf16.xpose.msra.mxu0 %v213_v25 }
  0xe2   :  { %386 = vmatprep.subr.bf16.mxu0 %v511_v51 }
  0xe9   :  { %387 = vmatpush3.bf16.xpose.msra.mxu0 %v216_v30 }
  0xf0   :  { %389 = vmatmul.mubr.msk.bf16.vlgmr.msra.gmra.mrb[0].mxu0 %vm59_vm0, %v182_v32 }
 0x1c3   :  { %v252_v46 = vpop.f32.mrb[0].mxu0 }
 0x1c4   :  { %v361_v45 = vadd.f32 -0.1, %v252_v46  ;;  %v270_v47 = vadd.f32 0.1, %v252_v46  ;;  %v390_v48 = vpop.f32.mrb[1].mxu0 }
 0x1c5   :  { %v255_v49 = vpop.f32.mrb[2].mxu0 }
 0x1c6   :  { %v269_v8 = vmul.f32 -32.0, %v361_v45  ;;  %v271_v50 = vmul.f32 32.0, %v270_v47  ;;  %v391_v9 = vpop.f32.mrb[3].mxu0 }
 0x1c8   :  { %v272_v52 = vsel %vm266_vm2, %v269_v8, %v271_v50 }
 0x1c9   :  { %v273_v51 = vmul.f32 1.442695, %v272_v52 }
 0x1cb   :  { %435 = vpow2.f32 %v273_v51 }
 0x1d5   :  { %v436_v53 = vpop.eup %435 }
 0x1d6   :  { %v282_v54 = vsel %vm267_vm4, %v436_v53, 0.0  ;;  %v275_v55 = vsel %vm266_vm2, %v436_v53, 0.0 }
 0x1d7   :  { %v283_v56 = vrot.slane %v282_v54, 4  ;;  %v276_v57 = vrot.slane %v275_v55, 4 }
 0x1d9   :  { %v284_v58 = vadd.f32 %v283_v56, %v282_v54  ;;  %v277_v16 = vadd.f32 %v276_v57, %v275_v55 }
 0x1db   :  { %v285_v17 = vrot.slane %v284_v58, 2  ;;  %v278_v59 = vrot.slane %v277_v16, 2 }
 0x1dd   :  { %v286_v60 = vadd.f32 %v285_v17, %v284_v58  ;;  %v279_v61 = vadd.f32 %v278_v59, %v277_v16 }
 0x1df   :  { %v287_v62 = vrot.slane %v286_v60, 1  ;;  %v280_v63 = vrot.slane %v279_v61, 1 }
 0x1e1   :  { %v288_v4 = vadd.f32 %v287_v62, %v286_v60  ;;  %v281_v5 = vadd.f32 %v280_v63, %v279_v61 }
 0x1e3   :  { %v301_v23 = vadd.f32 %v300_v22, %v288_v4  ;;  %v298_v7 = vadd.f32 %v297_v3, %v281_v5 }
 0x1e5   :  { %302 = vst [vmem:[#allocation5] sm:$0x1] %v301_v23  ;;  %299 = vst [vmem:[#allocation3] sm:$0x1] %v298_v7 }
 0x1ec   :  { %v314_v28 = vld [vmem:[#allocation5] sm:$0x1]  ;;  %v309_v10 = vld [vmem:[#allocation3] sm:$0x1] }
 0x1ed   :  { %v315_v11 = vadd.f32 1.0, %v314_v28  ;;  %v310_v12 = vadd.f32 1.0, %v309_v10 }
 0x1ef   :  { %437 = vlog2.f32 %v315_v11 }
 0x1f0   :  { %439 = vlog2.f32 %v310_v12 }
 0x1f9   :  { %v438_v29 = vpop.eup %437 }
 0x1fa   :  { %v440_v13 = vpop.eup %439  ;;  %v317_v14 = vmul.f32 0.6931472, %v438_v29 }
 0x1fb   :  { %v312_v34 = vmul.f32 0.6931472, %v440_v13 }
 0x1fc   :  { %318 = vst [vmem:[#allocation5] sm:$0x1] %v317_v14 }
 0x1fd   :  { %452 = shalt.err (!%p449_p4)
}
 0x1fe   :  { %s453_s11 = scalar_lea.hbm %s794_s4, 16 }
 0x1ff   :  { %p454_p5 = scmp.ne.s32.totalorder %s794_s4, %s453_s11  ;;  %p457_p6 = scmp.lt.u32.totalorder %s453_s11, %s794_s4 }
 0x201   :  { %p459_p7 = pnand %p457_p6, %p454_p5 }
 0x203   :  { %462 = shalt.err (!%p459_p7)
}
 0x204   :  { %338 = dma.vmem_to_hbm [thread:$0]  %s336_s27, 16, %s794_s4, [#allocation6]   ;;  %313 = vst [vmem:[#allocation3] sm:$0x1] %v312_v34 }
 0x205   :  { %s463_s18 = scalar_lea.vmem %s738_s29, 16  ;;  %s467_s19 = scalar_lea.vmem %s738_s29, 32 }
 0x206   :  { %p464_p8 = scmp.ne.s32.totalorder %s738_s29, %s463_s18  ;;  %p468_p9 = scmp.lt.s32.totalorder %s738_s29, %s738_s29 }
 0x207   :  { %p469_p10 = scmp.lt.s32.totalorder %s467_s19, %s463_s18 }
 0x209   :  { %p470_p11 = por %p469_p10, %p468_p9 }
 0x20b   :  { %p471_p12 = pnand %p470_p11, %p464_p8 }
 0x20d   :  { %474 = shalt.err (!%p471_p12)
}
 0x20e   :  { %s475_s22 = scalar_lea.hbm %s793_s3, 16 }
 0x20f   :  { %p476_p13 = scmp.ne.s32.totalorder %s793_s3, %s475_s22  ;;  %p479_p0 = scmp.lt.u32.totalorder %s475_s22, %s793_s3 }
 0x211   :  { %p481_p1 = pnand %p479_p0, %p476_p13 }
 0x213   :  { %484 = shalt.err (!%p481_p1)
}
 0x214   :  { %328 = dma.vmem_to_hbm [thread:$0]  %s738_s29, 16, %s793_s3, [#allocation4]  }
 0x215   :  { %s485_s1 = scalar_lea.vmem %s740_s6, 16  ;;  %s489_s2 = scalar_lea.vmem %s740_s6, 32 }
 0x216   :  { %p486_p2 = scmp.ne.s32.totalorder %s740_s6, %s485_s1  ;;  %p490_p3 = scmp.lt.s32.totalorder %s740_s6, %s740_s6 }
 0x217   :  { %p491_p4 = scmp.lt.s32.totalorder %s489_s2, %s485_s1 }
 0x219   :  { %p492_p5 = por %p491_p4, %p490_p3 }
 0x21b   :  { %p493_p6 = pnand %p492_p5, %p486_p2 }
 0x21d   :  { %496 = shalt.err (!%p493_p6)
}
 0x21e   :  { %s497_s30 = scalar_lea.hbm %s795_s5, 16 }
 0x21f   :  { %p498_p7 = scmp.ne.s32.totalorder %s795_s5, %s497_s30  ;;  %p501_p8 = scmp.lt.u32.totalorder %s497_s30, %s795_s5 }
 0x221   :  { %p503_p9 = pnand %p501_p8, %p498_p7 }
 0x223   :  { %506 = shalt.err (!%p503_p9)
}
 0x224   :  { %348 = dma.vmem_to_hbm [thread:$0]  %s740_s6, 16, %s795_s5, [#allocation6]  }
 0x225   :  { %507 = dma.done.wait [#allocation4], 16  }
 0x226   :  { %508 = vsyncadd [#allocation4], 4294967280 }
 0x227   :  { %509 = dma.done.wait [#allocation6], 32  }
 0x228   :  { %510 = vsyncadd [#allocation6], 4294967264 }
 0x229   :  { %358 = vsyncpa [#allocation4], 1 }
 0x22a   :  { %359 = vsyncpa [#allocation6], 1 }

</bundles_post_ra>
